<compile_context>
chip_gen: v7x
topology: tpu7x:2x2x1
jax: 0.10.0
libtpu: 0.0.40
codegen_flags: <defaults>
</compile_context>

<pallas_src>
import functools
import numpy as np
import jax
import jax.numpy as jnp
from jax.experimental import pallas as pl
from jax.experimental.pallas import tpu as pltpu


# ----------------------- Pallas kernel -----------------------

def _fused_concat_pw_conv_kernel(x0_ref, x1_ref, w0t_ref, w1t_ref, b_ref, o_ref,
                                 *, compute_dtype=None):
    # x0_ref, x1_ref: (Cin, thw)   -- the two "halves" of the channel concat
    # w0t_ref, w1t_ref: (Cout, Cin) -- 1x1 conv weight split along Cin, transposed
    # b_ref:          (Cout, 1)
    # o_ref:          (Cout, thw)
    x0 = x0_ref[...]
    x1 = x1_ref[...]
    if compute_dtype is not None:               # in-kernel cast: HBM stays f32
        x0 = x0.astype(compute_dtype)
        x1 = x1.astype(compute_dtype)
    acc = jnp.dot(w0t_ref[...], x0, preferred_element_type=jnp.float32)
    acc = acc + jnp.dot(w1t_ref[...], x1, preferred_element_type=jnp.float32)
    acc = acc + b_ref[...]                      # f32 epilogue, lane broadcast
    o_ref[...] = acc.astype(o_ref.dtype)


def _pick_hw_tile(hw, tm_hw):
    """Largest multiple-of-128 divisor of hw that is <= tm_hw; else full hw."""
    if hw % 128 != 0:
        return hw                               # full-extent block (always legal)
    k = hw // 128
    best = 128
    for d in range(1, k + 1):
        if k % d == 0 and d * 128 <= tm_hw:
            best = max(best, d * 128)
    return best


def convfusion_forward(params, x, *, tm_hw=2048, compute_dtype=None):
    """Fused cat(channel) + 1x1 conv (with bias), NCHW-native.

    params: dict with
        w0: (Cin, Cout)  -- weight rows for x[0]'s channels
        w1: (Cin, Cout)  -- weight rows for x[1]'s channels
        b:  (Cout,)
      (From PyTorch conv.weight of shape (Cout, 2*Cin, 1, 1):
        wT = weight[:, :, 0, 0].T ; w0 = wT[:Cin] ; w1 = wT[Cin:].)
    x: sequence of two NCHW arrays, each (N, Cin, H, W).
    Returns NCHW (N, Cout, H, W).
    """
    x0_nchw, x1_nchw = x[0], x[1]
    w0, w1, b = params["w0"], params["w1"], params["b"]
    N, Cin, H, W = x0_nchw.shape
    Cout = w0.shape[1]
    out_dtype = x0_nchw.dtype
    HW = H * W

    # Free reshapes (no copy), channels stay where NCHW put them.
    x0 = x0_nchw.reshape(N, Cin, HW)
    x1 = x1_nchw.reshape(N, Cin, HW)

    # Weights transposed once in the wrapper (tiny); bias as a (Cout, 1) column.
    w0t = jnp.transpose(w0)                     # (Cout, Cin)
    w1t = jnp.transpose(w1)
    if compute_dtype is not None:
        w0t = w0t.astype(compute_dtype)
        w1t = w1t.astype(compute_dtype)
    bf = b.reshape(Cout, 1).astype(jnp.float32)

    thw = _pick_hw_tile(HW, tm_hw)
    n_hw = HW // thw if HW % thw == 0 else 1    # full-extent fallback -> 1 tile

    # VMEM budget: double-buffered inputs + output + weights.  Only force a
    # larger scoped-VMEM limit if we would exceed the conservative v5e default.
    in_bytes = jnp.dtype(x0.dtype).itemsize
    out_bytes = jnp.dtype(out_dtype).itemsize
    w_bytes = jnp.dtype(w0t.dtype).itemsize
    vmem_est = 2 * (2 * Cin * thw * in_bytes + Cout * thw * out_bytes) \
        + 2 * (2 * Cout * Cin * w_bytes + Cout * 4)
    vmem_limit = int(min(vmem_est * 1.5, 48 << 20)) if vmem_est > (14 << 20) else None

    kernel = functools.partial(_fused_concat_pw_conv_kernel,
                               compute_dtype=compute_dtype)

    out = pl.pallas_call(
        kernel,
        out_shape=jax.ShapeDtypeStruct((N, Cout, HW), out_dtype),
        grid_spec=pltpu.PrefetchScalarGridSpec(
            num_scalar_prefetch=0,
            grid=(N, n_hw),
            in_specs=[
                pl.BlockSpec((None, Cin, thw), lambda n, j: (n, 0, j)),
                pl.BlockSpec((None, Cin, thw), lambda n, j: (n, 0, j)),
                pl.BlockSpec((Cout, Cin), lambda n, j: (0, 0)),
                pl.BlockSpec((Cout, Cin), lambda n, j: (0, 0)),
                pl.BlockSpec((Cout, 1), lambda n, j: (0, 0)),
            ],
            out_specs=pl.BlockSpec((None, Cout, thw), lambda n, j: (n, 0, j)),
        ),
        compiler_params=pltpu.CompilerParams(
            dimension_semantics=("parallel", "parallel"),
            vmem_limit_bytes=vmem_limit),
    )(x0, x1, w0t, w1t, bf)

    return out.reshape(N, Cout, H, W)           # free reshape back to NCHW


# ----------------------- pure-JAX reference -----------------------

def convfusion_reference(params, x):
    # cat along channels + 1x1 conv  ==  einsum over the channel axis + bias.
    w = jnp.concatenate([params["w0"], params["w1"]], axis=0)   # (2*Cin, Cout)
    r = jnp.concatenate([x[0], x[1]], axis=1)                   # (N, 2*Cin, H, W)
    y = jnp.einsum("nchw,cd->ndhw", r, w)
    return y + params["b"][None, :, None, None]


# ----------------------- deterministic params -----------------------

def init_convfusion_params(key, d_model):
    kw, kb = jax.random.split(key)
    # Equivalent of nn.Conv2d(2*d_model, d_model, 1) weight/bias.
    w = 0.05 * jax.random.normal(kw, (2 * d_model, d_model), jnp.float32)
    b = 0.1 * jax.random.normal(kb, (d_model,), jnp.float32)
    return {"w0": w[:d_model], "w1": w[d_model:], "b": b}


if __name__ == "__main__":
    key = jax.random.PRNGKey(0)
    k0, k1, kp = jax.random.split(key, 3)

    # Convfuision(d_model=128): inputs are a pair of NCHW tensors.
    N, D, H, W = 2, 128, 16, 16
    x0 = jax.random.normal(k0, (N, D, H, W), jnp.float32)
    x1 = jax.random.normal(k1, (N, D, H, W), jnp.float32)
    params = init_convfusion_params(kp, D)

    out = jax.block_until_ready(convfusion_forward(params, (x0, x1)))
    ref = jax.block_until_ready(convfusion_reference(params, (x0, x1)))

    assert out.shape == (N, D, H, W), out.shape
    np.testing.assert_allclose(np.asarray(out), np.asarray(ref),
                               rtol=2e-3, atol=2e-3)
    print("KERNEL_OK")
</pallas_src>

<mosaic_0001>
module attributes {stable_mosaic.version = 11 : i64} {
  func.func @_fused_concat_pw_conv_kernel(%arg0: i32, %arg1: i32, %arg2: memref<1x128x256xf32, #tpu.memory_space<vmem>>, %arg3: memref<1x128x256xf32, #tpu.memory_space<vmem>>, %arg4: memref<128x128xf32, #tpu.memory_space<vmem>>, %arg5: memref<128x128xf32, #tpu.memory_space<vmem>>, %arg6: memref<128x1xf32, #tpu.memory_space<vmem>>, %arg7: memref<1x128x256xf32, #tpu.memory_space<vmem>>) attributes {dimension_semantics = [#tpu.dimension_semantics<parallel>, #tpu.dimension_semantics<parallel>], iteration_bounds = array<i64: 2, 1>, scalar_prefetch = 0 : i64, scratch_operands = 0 : i64, tpu.core_type = #tpu.core_type<tc>, window_params = [{transform_indices = @transform_0, window_bounds = array<i64: 1, 128, 256>}, {transform_indices = @transform_1, window_bounds = array<i64: 1, 128, 256>}, {pipeline_mode = #tpu.pipeline_mode<synchronous>, transform_indices = @transform_2, window_bounds = array<i64: 128, 128>}, {pipeline_mode = #tpu.pipeline_mode<synchronous>, transform_indices = @transform_3, window_bounds = array<i64: 128, 128>}, {pipeline_mode = #tpu.pipeline_mode<synchronous>, transform_indices = @transform_4, window_bounds = array<i64: 128, 1>}, {transform_indices = @transform_5, window_bounds = array<i64: 1, 128, 256>}]} {
    %c0 = arith.constant 0 : index
    %c0_0 = arith.constant 0 : index
    %c0_1 = arith.constant 0 : index
    %0 = vector.load %arg2[%c0, %c0_0, %c0_1] : memref<1x128x256xf32, #tpu.memory_space<vmem>>, vector<1x128x256xf32>
    %1 = vector.shape_cast %0 : vector<1x128x256xf32> to vector<128x256xf32>
    %c0_2 = arith.constant 0 : index
    %c0_3 = arith.constant 0 : index
    %c0_4 = arith.constant 0 : index
    %2 = vector.load %arg3[%c0_2, %c0_3, %c0_4] : memref<1x128x256xf32, #tpu.memory_space<vmem>>, vector<1x128x256xf32>
    %3 = vector.shape_cast %2 : vector<1x128x256xf32> to vector<128x256xf32>
    %c0_5 = arith.constant 0 : index
    %c0_6 = arith.constant 0 : index
    %4 = vector.load %arg4[%c0_5, %c0_6] : memref<128x128xf32, #tpu.memory_space<vmem>>, vector<128x128xf32>
    %cst = arith.constant dense<0.000000e+00> : vector<128x256xf32>
    %5 = tpu.matmul %4, %1, %cst {dimension_numbers = #tpu.dot_dimension_numbers<[1], [0], [0], [1], [0, 0, 1, 1], [], []>} : vector<128x128xf32>, vector<128x256xf32>, vector<128x256xf32> -> vector<128x256xf32>
    %c0_7 = arith.constant 0 : index
    %c0_8 = arith.constant 0 : index
    %6 = vector.load %arg5[%c0_7, %c0_8] : memref<128x128xf32, #tpu.memory_space<vmem>>, vector<128x128xf32>
    %cst_9 = arith.constant dense<0.000000e+00> : vector<128x256xf32>
    %7 = tpu.matmul %6, %3, %cst_9 {dimension_numbers = #tpu.dot_dimension_numbers<[1], [0], [0], [1], [0, 0, 1, 1], [], []>} : vector<128x128xf32>, vector<128x256xf32>, vector<128x256xf32> -> vector<128x256xf32>
    %8 = arith.addf %5, %7 : vector<128x256xf32>
    %c0_10 = arith.constant 0 : index
    %c0_11 = arith.constant 0 : index
    %9 = vector.load %arg6[%c0_10, %c0_11] : memref<128x1xf32, #tpu.memory_space<vmem>>, vector<128x1xf32>
    %10 = vector.broadcast %9 : vector<128x1xf32> to vector<128x256xf32>
    %11 = arith.addf %8, %10 : vector<128x256xf32>
    %c0_12 = arith.constant 0 : index
    %c0_13 = arith.constant 0 : index
    %c0_14 = arith.constant 0 : index
    %12 = vector.load %arg7[%c0_12, %c0_13, %c0_14] : memref<1x128x256xf32, #tpu.memory_space<vmem>>, vector<1x128x256xf32>
    %13 = vector.shape_cast %12 : vector<1x128x256xf32> to vector<128x256xf32>
    %14 = vector.shape_cast %11 : vector<128x256xf32> to vector<1x128x256xf32>
    tpu.vector_store %arg7[%c0_12, %c0_13, %c0_14], %14 {strides = array<i32>} : memref<1x128x256xf32, #tpu.memory_space<vmem>>, vector<1x128x256xf32>,
    return
  }
  func.func @transform_0(%arg0: i32, %arg1: i32) -> (i32, i32, i32) {
    %c0_i32 = arith.constant 0 : i32
    %c0_i32_0 = arith.constant 0 : i32
    return %arg0, %c0_i32, %arg1 : i32, i32, i32
  }
  func.func @transform_1(%arg0: i32, %arg1: i32) -> (i32, i32, i32) {
    %c0_i32 = arith.constant 0 : i32
    %c0_i32_0 = arith.constant 0 : i32
    return %arg0, %c0_i32, %arg1 : i32, i32, i32
  }
  func.func @transform_2(%arg0: i32, %arg1: i32) -> (i32, i32) {
    %c0_i32 = arith.constant 0 : i32
    %c0_i32_0 = arith.constant 0 : i32
    %c0_i32_1 = arith.constant 0 : i32
    return %c0_i32, %c0_i32_0 : i32, i32
  }
  func.func @transform_3(%arg0: i32, %arg1: i32) -> (i32, i32) {
    %c0_i32 = arith.constant 0 : i32
    %c0_i32_0 = arith.constant 0 : i32
    %c0_i32_1 = arith.constant 0 : i32
    return %c0_i32, %c0_i32_0 : i32, i32
  }
  func.func @transform_4(%arg0: i32, %arg1: i32) -> (i32, i32) {
    %c0_i32 = arith.constant 0 : i32
    %c0_i32_0 = arith.constant 0 : i32
    %c0_i32_1 = arith.constant 0 : i32
    return %c0_i32, %c0_i32_0 : i32, i32
  }
  func.func @transform_5(%arg0: i32, %arg1: i32) -> (i32, i32, i32) {
    %c0_i32 = arith.constant 0 : i32
    %c0_i32_0 = arith.constant 0 : i32
    return %arg0, %c0_i32, %arg1 : i32, i32, i32
  }
}

</mosaic_0001>

<bundles_post_ra>
// kernel: tpu_custom_call.1
= control target key start
LH: loop header
LB: loop body
LE: loop exit
PB: predicated region body
PF: predicated region fallthrough
CT: control target
= control target key end

     0   :  { %s1972_s0 = inlined_call_operand.hbm [shape: f32[2,128,256], index: 0, kind: input, shape index: {}]   ;;  %s1973_s1 = inlined_call_operand.hbm [shape: f32[2,128,256], index: 1, kind: input, shape index: {}]   ;;  %s1974_s2 = inlined_call_operand.vmem [shape: f32[128,128], index: 2, kind: input, shape index: {}]   ;;  %s1975_s3 = inlined_call_operand.hbm [shape: f32[128,128], index: 3, kind: input, shape index: {}]   ;;  %s1976_s4 = inlined_call_operand.vmem [shape: f32[128,1], index: 4, kind: input, shape index: {}]   ;;  %s1977_s5 = inlined_call_operand.hbm [shape: f32[2,128,256], index: 5, kind: output, shape index: {}]  }
   0x1   :  { %1983 = sst [smem:[#allocation15_spill]] %s1972_s0 }
   0x2   :  { %1984 = sst [smem:[#allocation16_spill]] %s1975_s3 }
   0x3   :  { %10 = vsyncpa [#allocation3], 0 }
   0x4   :  { %12 = vsyncpa [#allocation3 + $0x1], 0 }
   0x5   :  { %13 = vsyncpa [#allocation6], 0 }
   0x6   :  { %15 = vsyncpa [#allocation6 + $0x1], 0 }
   0x7   :  { %16 = vsyncpa [#allocation4], 0 }
   0x8   :  { %18 = vsyncpa [#allocation4 + $0x1], 0  ;;  %s1468_s18 = smov 0   ;;  %s1470_s19 = smov 0  }
   0x9   :  { %s1472_s20 = smov 0   ;;  %s1474_s21 = smov 0  }
   0xa   :  { %s1476_s22 = smov 0   ;;  %s1478_s23 = smov 0  }
   0xb LB: > { %s1499_s24 = sadd.s32 4294967295, %s1424_s23   ;;  %s1039_s25 = sadd.s32 4294967294, %s1424_s23   ;;  %s1424_s23 = sphi %s1478_s23, %s24_s23   ;;  %s1420_s22 = sphi %s1476_s22, %s2010_s22   ;;  %s1416_s21 = sphi %s1474_s21, %s2009_s21   ;;  %s1412_s20 = sphi %s1472_s20, %s2008_s20   ;;  %s1408_s19 = sphi %s1470_s19, %s2007_s19   ;;  %s1404_s18 = sphi %s1468_s18, %s2006_s18  }
   0xc   : > { %p58_p0 = scmp.ne.s32.totalorder %s1408_s19, %s1404_s18  ;;  %p1978_p1 = scmp.eq.s32.totalorder %s1499_s24, 0 }
   0xd   : > { %p181_p3 = scmp.eq.s32.totalorder %s1039_s25, 1  ;;  %p1040_p5 = scmp.ge.s32.totalorder %s1424_s23, 1 }
   0xe   : > { %p1508_p4 = por %p1978_p1, %p58_p0  ;;  %p188_p7 = scmp.lt.s32.totalorder %s1424_s23, 3 }
   0xf   : > { %p1513_p6 = por %p181_p3, %p58_p0  ;;  %s1426_s29 = smov [#allocation7]  }
  0x10   : > { %s1985_s26 = scalar_select %p1508_p4, 1, 0 }
  0x11   : > { %s1986_s27 = scalar_select %p1513_p6, 1, 0 }
  0x12   : > { %p1518_p8 = pnand %p1040_p5, %p188_p7  ;;  %s203_s30 = sshll.u32 %s1426_s29, 4  ;;  %s204_s30 = int_to_ptr.vmem [resolvable:$true] %s203_s30 }
  0x13   : > { %s36_s7 = sadd.s32 1, %s1420_s22  ;;  %s1989_s3 = sld [smem:[#allocation16_spill]] }
  0x14   : > { %s1987_s28 = scalar_select %p1518_p8, 1, 0 }
  0x15   : > { %p1168_p9 = pneg %p1518_p8 }
  0x17   : > { %p1527_p11 = pnand %p1168_p9, %p1978_p1 }
  0x19   : > { %s1246_s10 = scalar_lea.hbm %s1989_s3, 2048  ;;  %p1248_p13 = pneg %p1527_p11 }
  0x1a   : > { %p1247_p12 = scmp.ne.s32.totalorder %s1989_s3, %s1246_s10  ;;  %p1253_p5 = scmp.lt.u32.totalorder %s1246_s10, %s1989_s3 }
  0x1c   : > { %p1249_p0 = pnand %p1248_p13, %p1247_p12 }
  0x1e   : > { %p1250_p3 = pneg %p1249_p0 }
  0x20   : > { %p1255_p7 = pnand %p1253_p5, %p1250_p3 }
  0x22   : > { %1258 = shalt.err (!%p1255_p7)
}
  0x23   : > { %s1259_s15 = scalar_lea.vmem %s204_s30, 2048  ;;  %p1267_p2 = scmp.lt.s32.totalorder %s204_s30, %s204_s30 }
  0x24   : > { %p1260_p9 = scmp.ne.s32.totalorder %s204_s30, %s1259_s15  ;;  %p1268_p6 = scmp.lt.s32.totalorder %s1259_s15, %s1259_s15 }
  0x26   : > { %p1262_p10 = pnand %p1260_p9, %p1248_p13  ;;  %p1269_p4 = por %p1268_p6, %p1267_p2 }
  0x28   : > { %p1263_p1 = pneg %p1262_p10 }
  0x2a   : > { %p1270_p8 = pnand %p1269_p4, %p1263_p1 }
  0x2c   : > { %1273 = shalt.err (!%p1270_p8)
}
  0x2d   : > { %s1427_s16 = smov 128   ;;  %s1428_s17 = smov 8  }
  0x2e   : > { %1171 = dma.hbm_to_vmem [thread:$0]  (!%p1527_p11), %s1989_s3, 2048, %s204_s30, [#allocation6], %s1427_s16, %s1427_s16, %s1428_s17  }
  0x2f   : > { %p38_p1 = scmp.ge.s32.totalorder %s36_s7, 2  ;;  %s45_s8 = sadd.s32 1, %s1412_s20 }
  0x30   : > { %p52_p2 = scmp.ne.s32.totalorder %s1412_s20, %s1408_s19  ;;  %p53_p4 = scmp.eq.s32.totalorder %s1424_s23, 0 }
  0x31   : > { %s2012_s7 = smov (%p38_p1, %s36_s7), 0  ;;  %p1992_p8 = scmp.eq.s32.totalorder %s1499_s24, 1 }
  0x32   : > { %1990 = sst [smem:[#allocation13_spill]] %s2012_s7  ;;  %p1554_p6 = por %p53_p4, %p52_p2 }
  0x33   : > { %p1560_p10 = por %p1992_p8, %p52_p2  ;;  %s40_s10 = ssub.s32 %s1420_s22, %s2012_s7 }
  0x34   : > { %p1184_p12 = scmp.lt.s32.totalorder %s1424_s23, 2  ;;  %p43_p11 = scmp.eq.s32.totalorder %s40_s10, 0 }
  0x35   : > { %s220_s30 = sand.u32 1, %s1412_s20   ;;  %s1981_s13 = sshll.u32 %s1420_s22, 12 }
  0x36   : > { %s1568_s11 = sshll.u32 %s220_s30, 8  ;;  %s1995_s0 = sld [smem:[#allocation15_spill]] }
  0x37   : > { %s1571_s12 = scalar_select %p43_p11, %s1412_s20, %s45_s8  }
  0x38   : > { %s224_s17 = scalar_lea.vmem [#allocation2], %s1568_s11  ;;  %p1586_p13 = pnand %p1184_p12, %p1554_p6 }
  0x39   : > { %1994 = sst [smem:[#allocation14_spill]] %s1571_s12  ;;  %s233_s25 = sshll.u32 %s224_s17, 4  ;;  %s1582_s25 = int_to_ptr.vmem [resolvable:$true] %s233_s25 }
  0x3a   : > { %s1590_s8 = scalar_lea.sflag [#allocation3], %s220_s30  ;;  %p1276_p3 = pneg %p1586_p13 }
  0x3c   : > { %s1579_s16 = scalar_lea.hbm %s1995_s0, %s1981_s13  ;;  %s1279_s9 = scalar_lea.hbm %s1995_s0, 8192 }
  0x3d   : > { %s1274_s10 = scalar_lea.hbm %s1579_s16, 4096  ;;  %p1280_p9 = scmp.lt.u32.totalorder %s1579_s16, %s1995_s0 }
  0x3e   : > { %p1275_p0 = scmp.ne.s32.totalorder %s1579_s16, %s1274_s10  ;;  %p1281_p1 = scmp.lt.u32.totalorder %s1279_s9, %s1274_s10 }
  0x3f   : > { %p1283_p4 = scmp.lt.u32.totalorder %s1274_s10, %s1579_s16 }
  0x40   : > { %p1277_p5 = pnand %p1276_p3, %p1275_p0  ;;  %p1282_p2 = por %p1281_p1, %p1280_p9 }
  0x42   : > { %p1278_p7 = pneg %p1277_p5  ;;  %p1284_p6 = por %p1283_p4, %p1282_p2 }
  0x44   : > { %p1285_p8 = pnand %p1284_p6, %p1278_p7 }
  0x46   : > { %1288 = shalt.err (!%p1285_p8)
}
  0x47   : > { %s1289_s30 = scalar_lea.vmem %s1582_s25, 4096  ;;  %s1429_s14 = smov [#allocation2]  }
  0x48   : > { %p1290_p12 = scmp.ne.s32.totalorder %s1582_s25, %s1289_s30  ;;  %s1294_s15 = sshll.u32 %s1429_s14, 4  ;;  %s1295_s15 = int_to_ptr.vmem [resolvable:$false] %s1294_s15 }
  0x49   : > { %s1296_s13 = scalar_lea.vmem %s1295_s15, 8192  ;;  %p1297_p5 = scmp.lt.s32.totalorder %s1582_s25, %s1295_s15 }
  0x4a   : > { %p1292_p11 = pnand %p1290_p12, %p1276_p3  ;;  %p1298_p9 = scmp.lt.s32.totalorder %s1296_s13, %s1289_s30 }
  0x4c   : > { %p1293_p0 = pneg %p1292_p11  ;;  %p1299_p1 = por %p1298_p9, %p1297_p5 }
  0x4e   : > { %p1300_p2 = pnand %p1299_p1, %p1293_p0 }
  0x50   : > { %1303 = shalt.err (!%p1300_p2)
}
  0x51   : > { %s1430_s10 = smov 256   ;;  %s1431_s9 = smov 16  }
  0x52   : > { %1175 = dma.hbm_to_vmem [thread:$0]  (!%p1586_p13), %s1579_s16, 4096, %s1582_s25, %s1590_s8, %s1430_s10, %s1430_s10, %s1431_s9  }
  0x53   : > { %s1997_s17 = sshll.u32 %s1420_s22, 12  ;;  %s247_s13 = scalar_lea.vmem [#allocation5], %s1568_s11 }
  0x54   : > { %s1626_s15 = scalar_lea.hbm %s1973_s1, %s1997_s17  ;;  %s256_s0 = sshll.u32 %s247_s13, 4  ;;  %s1629_s0 = int_to_ptr.vmem [resolvable:$true] %s256_s0 }
  0x55   : > { %s243_s3 = sand.u32 1, %s1424_s23   ;;  %s1304_s12 = scalar_lea.hbm %s1626_s15, 4096 }
  0x56   : > { %s1632_s7 = scalar_lea.sflag [#allocation6], %s243_s3  ;;  %p1305_p7 = scmp.ne.s32.totalorder %s1626_s15, %s1304_s12 }
  0x57   : > { %s1309_s8 = scalar_lea.hbm %s1973_s1, 8192  ;;  %p1310_p8 = scmp.lt.u32.totalorder %s1626_s15, %s1973_s1 }
  0x58   : > { %p1307_p4 = pnand %p1305_p7, %p1276_p3  ;;  %p1311_p12 = scmp.lt.u32.totalorder %s1309_s8, %s1304_s12 }
  0x59   : > { %p1313_p0 = scmp.lt.u32.totalorder %s1304_s12, %s1626_s15 }
  0x5a   : > { %p1308_p6 = pneg %p1307_p4  ;;  %p1312_p11 = por %p1311_p12, %p1310_p8 }
  0x5c   : > { %p1314_p5 = por %p1313_p0, %p1312_p11 }
  0x5e   : > { %p1315_p9 = pnand %p1314_p5, %p1308_p6 }
  0x60   : > { %1318 = shalt.err (!%p1315_p9)
}
  0x61   : > { %s1319_s3 = scalar_lea.vmem %s1629_s0, 4096  ;;  %s1432_s11 = smov [#allocation5]  }
  0x62   : > { %p1320_p1 = scmp.ne.s32.totalorder %s1629_s0, %s1319_s3  ;;  %s1324_s14 = sshll.u32 %s1432_s11, 4  ;;  %s1325_s14 = int_to_ptr.vmem [resolvable:$false] %s1324_s14 }
  0x63   : > { %s1326_s13 = scalar_lea.vmem %s1325_s14, 8192  ;;  %p1327_p4 = scmp.lt.s32.totalorder %s1629_s0, %s1325_s14 }
  0x64   : > { %p1322_p2 = pnand %p1320_p1, %p1276_p3  ;;  %p1328_p8 = scmp.lt.s32.totalorder %s1326_s13, %s1319_s3 }
  0x66   : > { %p1323_p7 = pneg %p1322_p2  ;;  %p1329_p12 = por %p1328_p8, %p1327_p4 }
  0x68   : > { %p1330_p11 = pnand %p1329_p12, %p1323_p7 }
  0x6a   : > { %1333 = shalt.err (!%p1330_p11)
}
  0x6b   : > { %1178 = dma.hbm_to_vmem [thread:$0]  (!%p1586_p13), %s1626_s15, 4096, %s1629_s0, %s1632_s7, %s1430_s10, %s1430_s10, %s1431_s9  }
  0x6c   : > { %p1998_p3 = scmp.ne.s32.totalorder %s1987_s28, 0 }
  0x6d   : > { %s1664_s12 = sand.u32 (!%p1998_p3), 1, %s1408_s19   ;;  %p1999_p6 = scmp.ne.s32.totalorder (!%p1998_p3), %s1985_s26, 0 }
  0x6e   : > { %268 = sbr.rel (%p1998_p3) target bundleno = 453 (0x1c5), region = 40  ;;  %s1667_s16 = sshll.u32 (!%p1998_p3), %s1664_s12, 8 }
  0x6f   : > { %s271_s29 = scalar_lea.sflag (!%p1998_p3), [#allocation3], %s1664_s12  ;;  %s1671_s25 = scalar_lea.vmem (!%p1998_p3), [#allocation2], %s1667_s16 }
  0x75   : > { %1387 = dma.done.wait (%p1999_p6), %s271_s29, 4096  }
  0x76   : > { %1389 = vsyncadd (%p1999_p6), %s271_s29, 4294963200  ;;  %s279_s0 = sand.u32 1, %s1499_s24   ;;  %s1679_s7 = scalar_lea.vmem [#allocation5], %s1667_s16 }
  0x77   : > { %s280_s28 = scalar_lea.sflag [#allocation6], %s279_s0 }
  0x78   : > { %1391 = dma.done.wait (%p1999_p6), %s280_s28, 4096  }
  0x79   : > { %1393 = vsyncadd (%p1999_p6), %s280_s28, 4294963200  ;;  %p2000_p13 = scmp.eq.s32.totalorder %s1499_s24, 0 }
  0x7b   : > { %1395 = dma.done.wait (%p2000_p13), [#allocation6], 2048   ;;  %p2001_p0 = pmov %p2000_p13 }
  0x7c   : > { %v1433_v0 = vmov 0.0   ;;  %v1434_v1 = vmov 0   ;;  %v355_v2 = vld [vmem:[%s1679_s7 + $0x8] sm:$0xff]  ;;  %v357_v3 = vld [vmem:[%s1679_s7 + $0x18] sm:$0xff]  ;;  %v354_v7 = vld [vmem:[%s1679_s7] sm:$0xff]  ;;  %s1435_s10 = smov [#allocation8]  }
  0x7d   : > { %1397 = vsyncadd (%p2001_p0), [#allocation6], 4294965248  ;;  %482 = vmatprep.mubr.f32.mxu1 %v1433_v0  ;;  %643 = vmatprep.mubr.f32.mxu0 %v1433_v0  ;;  %v323_v4 = vld [vmem:[%s1671_s25 + $0x8] sm:$0xff]  ;;  %v1062_v5 = vpack.c.bf16 %v357_v3, %v355_v2  ;;  %v325_v6 = vld [vmem:[%s1671_s25 + $0x18] sm:$0xff]  ;;  %s1338_s9 = sshll.u32 %s1435_s10, 4  ;;  %s1339_s9 = int_to_ptr.vmem [resolvable:$false] %s1338_s9 }
  0x7e   : > { %1244 = vset.pattern.permute.xlu0 %v1434_v1  ;;  %1245 = vset.pattern.permute.xlu1 %v1434_v1  ;;  %v356_v8 = vld [vmem:[%s1679_s7 + $0x10] sm:$0xff]  ;;  %v1094_v9 = vpack.c.bf16 %v325_v6, %v323_v4  ;;  %v322_v11 = vld [vmem:[%s1671_s25] sm:$0xff]  ;;  %v359_v13 = vld [vmem:[%s1679_s7 + $0x28] sm:$0xff]  ;;  %s1340_s15 = scalar_lea.vmem %s1339_s9, 8192 }
  0x7f   : > { %v1064_v10 = vpack.c.bf16 %v356_v8, %v354_v7  ;;  %v324_v12 = vld [vmem:[%s1671_s25 + $0x10] sm:$0xff]  ;;  %1063 = vmatprep.subr.bf16.mxu1 %v1062_v5  ;;  %v361_v15 = vld [vmem:[%s1679_s7 + $0x38] sm:$0xff]  ;;  %v327_v16 = vld [vmem:[%s1671_s25 + $0x28] sm:$0xff] }
  0x80   : > { %v1096_v14 = vpack.c.bf16 %v324_v12, %v322_v11  ;;  %v329_v17 = vld [vmem:[%s1671_s25 + $0x38] sm:$0xff]  ;;  %1095 = vmatprep.subr.bf16.mxu0 %v1094_v9  ;;  %v1066_v18 = vpack.c.bf16 %v361_v15, %v359_v13  ;;  %v358_v20 = vld [vmem:[%s1679_s7 + $0x20] sm:$0xff]  ;;  %v360_v21 = vld [vmem:[%s1679_s7 + $0x30] sm:$0xff] }
  0x81   : > { %1065 = vmatpush1.bf16.msra.mxu1 %v1064_v10  ;;  %v1098_v19 = vpack.c.bf16 %v329_v17, %v327_v16  ;;  %v326_v22 = vld [vmem:[%s1671_s25 + $0x20] sm:$0xff]  ;;  %v1068_v23 = vpack.c.bf16 %v360_v21, %v358_v20  ;;  %v328_v24 = vld [vmem:[%s1671_s25 + $0x30] sm:$0xff]  ;;  %v363_v25 = vld [vmem:[%s1679_s7 + $0x48] sm:$0xff] }
  0x82   : > { %1097 = vmatpush1.bf16.msra.mxu0 %v1096_v14  ;;  %v365_v26 = vld [vmem:[%s1679_s7 + $0x58] sm:$0xff]  ;;  %1067 = vmatprep.subr.bf16.mxu1 %v1066_v18  ;;  %v1100_v27 = vpack.c.bf16 %v328_v24, %v326_v22  ;;  %v331_v29 = vld [vmem:[%s1671_s25 + $0x48] sm:$0xff]  ;;  %v362_v31 = vld [vmem:[%s1679_s7 + $0x40] sm:$0xff] }
  0x83   : > { %1099 = vmatprep.subr.bf16.mxu0 %v1098_v19  ;;  %v1070_v28 = vpack.c.bf16 %v365_v26, %v363_v25  ;;  %v333_v30 = vld [vmem:[%s1671_s25 + $0x58] sm:$0xff]  ;;  %v364_v33 = vld [vmem:[%s1679_s7 + $0x50] sm:$0xff]  ;;  %v330_v34 = vld [vmem:[%s1671_s25 + $0x40] sm:$0xff] }
  0x84   : > { %v1102_v32 = vpack.c.bf16 %v333_v30, %v331_v29  ;;  %v332_v35 = vld [vmem:[%s1671_s25 + $0x50] sm:$0xff]  ;;  %v1072_v36 = vpack.c.bf16 %v364_v33, %v362_v31  ;;  %v367_v37 = vld [vmem:[%s1679_s7 + $0x68] sm:$0xff]  ;;  %v369_v38 = vld [vmem:[%s1679_s7 + $0x78] sm:$0xff] }
  0x85   : > { %1069 = vmatpush1.bf16.msra.mxu1 %v1068_v23  ;;  %v335_v39 = vld [vmem:[%s1671_s25 + $0x68] sm:$0xff]  ;;  %v1104_v40 = vpack.c.bf16 %v332_v35, %v330_v34  ;;  %v1074_v41 = vpack.c.bf16 %v369_v38, %v367_v37  ;;  %v337_v42 = vld [vmem:[%s1671_s25 + $0x78] sm:$0xff]  ;;  %v366_v43 = vld [vmem:[%s1679_s7 + $0x60] sm:$0xff] }
  0x86   : > { %1101 = vmatpush1.bf16.msra.mxu0 %v1100_v27  ;;  %1071 = vmatprep.subr.bf16.mxu1 %v1070_v28  ;;  %v368_v44 = vld [vmem:[%s1679_s7 + $0x70] sm:$0xff]  ;;  %v1106_v45 = vpack.c.bf16 %v337_v42, %v335_v39  ;;  %v334_v46 = vld [vmem:[%s1671_s25 + $0x60] sm:$0xff]  ;;  %v371_v48 = vld [vmem:[%s1679_s7 + $0x88] sm:$0xff] }
  0x87   : > { %1103 = vmatprep.subr.bf16.mxu0 %v1102_v32  ;;  %v336_v47 = vld [vmem:[%s1671_s25 + $0x70] sm:$0xff]  ;;  %v373_v49 = vld [vmem:[%s1679_s7 + $0x98] sm:$0xff]  ;;  %v339_v50 = vld [vmem:[%s1671_s25 + $0x88] sm:$0xff]  ;;  %v1076_v52 = vpack.c.bf16 %v368_v44, %v366_v43 }
  0x88   : > { %v341_v51 = vld [vmem:[%s1671_s25 + $0x98] sm:$0xff]  ;;  %v1108_v53 = vpack.c.bf16 %v336_v47, %v334_v46  ;;  %v1078_v54 = vpack.c.bf16 %v373_v49, %v371_v48  ;;  %v370_v55 = vld [vmem:[%s1679_s7 + $0x80] sm:$0xff]  ;;  %v372_v56 = vld [vmem:[%s1679_s7 + $0x90] sm:$0xff] }
  0x89   : > { %1073 = vmatpush1.bf16.msra.mxu1 %v1072_v36  ;;  %v338_v57 = vld [vmem:[%s1671_s25 + $0x80] sm:$0xff]  ;;  %v1110_v58 = vpack.c.bf16 %v341_v51, %v339_v50  ;;  %v340_v59 = vld [vmem:[%s1671_s25 + $0x90] sm:$0xff]  ;;  %v375_v60 = vld [vmem:[%s1679_s7 + $0xa8] sm:$0xff]  ;;  %v1080_v1 = vpack.c.bf16 %v372_v56, %v370_v55 }
  0x8a   : > { %1105 = vmatpush1.bf16.msra.mxu0 %v1104_v40  ;;  %1075 = vmatprep.subr.bf16.mxu1 %v1074_v41  ;;  %v377_v61 = vld [vmem:[%s1679_s7 + $0xb8] sm:$0xff]  ;;  %v343_v62 = vld [vmem:[%s1671_s25 + $0xa8] sm:$0xff]  ;;  %v1112_v2 = vpack.c.bf16 %v340_v59, %v338_v57  ;;  %v374_v4 = vld [vmem:[%s1679_s7 + $0xa0] sm:$0xff] }
  0x8b   : > { %1107 = vmatprep.subr.bf16.mxu0 %v1106_v45  ;;  %v345_v63 = vld [vmem:[%s1671_s25 + $0xb8] sm:$0xff]  ;;  %v1082_v3 = vpack.c.bf16 %v377_v61, %v375_v60  ;;  %v376_v5 = vld [vmem:[%s1679_s7 + $0xb0] sm:$0xff]  ;;  %v342_v6 = vld [vmem:[%s1671_s25 + $0xa0] sm:$0xff] }
  0x8c   : > { %v1114_v7 = vpack.c.bf16 %v345_v63, %v343_v62  ;;  %v344_v8 = vld [vmem:[%s1671_s25 + $0xb0] sm:$0xff]  ;;  %v379_v9 = vld [vmem:[%s1679_s7 + $0xc8] sm:$0xff]  ;;  %v381_v10 = vld [vmem:[%s1679_s7 + $0xd8] sm:$0xff]  ;;  %v1084_v13 = vpack.c.bf16 %v376_v5, %v374_v4 }
  0x8d   : > { %1077 = vmatpush1.bf16.msra.mxu1 %v1076_v52  ;;  %v347_v11 = vld [vmem:[%s1671_s25 + $0xc8] sm:$0xff]  ;;  %v349_v12 = vld [vmem:[%s1671_s25 + $0xd8] sm:$0xff]  ;;  %v1116_v14 = vpack.c.bf16 %v344_v8, %v342_v6  ;;  %v1086_v15 = vpack.c.bf16 %v381_v10, %v379_v9  ;;  %v378_v16 = vld [vmem:[%s1679_s7 + $0xc0] sm:$0xff] }
  0x8e   : > { %1109 = vmatpush1.bf16.msra.mxu0 %v1108_v53  ;;  %1079 = vmatprep.subr.bf16.mxu1 %v1078_v54  ;;  %v380_v17 = vld [vmem:[%s1679_s7 + $0xd0] sm:$0xff]  ;;  %v346_v18 = vld [vmem:[%s1671_s25 + $0xc0] sm:$0xff]  ;;  %v1118_v19 = vpack.c.bf16 %v349_v12, %v347_v11  ;;  %v383_v21 = vld [vmem:[%s1679_s7 + $0xe8] sm:$0xff] }
  0x8f   : > { %1111 = vmatprep.subr.bf16.mxu0 %v1110_v58  ;;  %v348_v20 = vld [vmem:[%s1671_s25 + $0xd0] sm:$0xff]  ;;  %v385_v22 = vld [vmem:[%s1679_s7 + $0xf8] sm:$0xff]  ;;  %v351_v23 = vld [vmem:[%s1671_s25 + $0xe8] sm:$0xff]  ;;  %v1088_v25 = vpack.c.bf16 %v380_v17, %v378_v16 }
  0x90   : > { %v353_v24 = vld [vmem:[%s1671_s25 + $0xf8] sm:$0xff]  ;;  %v1120_v26 = vpack.c.bf16 %v348_v20, %v346_v18  ;;  %v1090_v27 = vpack.c.bf16 %v385_v22, %v383_v21  ;;  %v382_v28 = vld [vmem:[%s1679_s7 + $0xe0] sm:$0xff]  ;;  %v384_v29 = vld [vmem:[%s1679_s7 + $0xf0] sm:$0xff] }
  0x91   : > { %1081 = vmatpush1.bf16.msra.mxu1 %v1080_v1  ;;  %v1122_v30 = vpack.c.bf16 %v353_v24, %v351_v23  ;;  %v350_v31 = vld [vmem:[%s1671_s25 + $0xe0] sm:$0xff]  ;;  %v352_v32 = vld [vmem:[%s1671_s25 + $0xf0] sm:$0xff]  ;;  %v1092_v33 = vpack.c.bf16 %v384_v29, %v382_v28  ;;  %v741_v39 = vld [vmem:[%s1976_s4 + $0x8] sm:$0xff]  ;;  %s1882_s25 = scalar_lea.vmem [#allocation8], %s1667_s16  ;;  %s1061_s16 = sshll.u32 %s1416_s21, 12 }
  0x92   : > { %1113 = vmatpush1.bf16.msra.mxu0 %v1112_v2  ;;  %1083 = vmatprep.subr.bf16.mxu1 %v1082_v3  ;;  %v1124_v34 = vpack.c.bf16 %v352_v32, %v350_v31  ;;  %v402_v35 = vld [vmem:[#allocation7] sm:$0xff]  ;;  %v742_v37 = vld [vmem:[%s1976_s4 + $0x10] sm:$0xff]  ;;  %v743_v40 = vld [vmem:[%s1976_s4 + $0x18] sm:$0xff]  ;;  %s916_s0 = sshll.u32 %s1882_s25, 4  ;;  %s1919_s24 = scalar_lea.hbm %s1977_s5, %s1061_s16  ;;  %s1921_s0 = int_to_ptr.vmem [resolvable:$true] %s916_s0 }
  0x93   : > { %1115 = vmatprep.subr.bf16.mxu0 %v1114_v7  ;;  %v740_v36 = vld [vmem:[%s1976_s4] sm:$0xff]  ;;  %768 = vperm.xlu1 %1245, %v742_v37   ;;  %v403_v41 = vld [vmem:[#allocation7 + $0x8] sm:$0xff]  ;;  %v404_v45 = vld [vmem:[#allocation7 + $0x10] sm:$0xff]  ;;  %s901_s21 = scalar_lea.sflag [#allocation4], %s1664_s12  ;;  %s1334_s26 = scalar_lea.vmem %s1921_s0, 4096 }
  0x94   : > { %v386_v38 = vld [vmem:[%s1974_s2] sm:$0xff]  ;;  %758 = vperm.xlu0 %1244, %v740_v36   ;;  %v387_v42 = vld [vmem:[%s1974_s2 + $0x8] sm:$0xff]  ;;  %v388_v46 = vld [vmem:[%s1974_s2 + $0x10] sm:$0xff]  ;;  %p1335_p5 = scmp.ne.s32.totalorder %s1921_s0, %s1334_s26  ;;  %p1341_p2 = scmp.lt.s32.totalorder %s1921_s0, %s1339_s9 }
  0x95   : > { %1085 = vmatpush1.bf16.msra.mxu1 %v1084_v13  ;;  %v744_v43 = vld [vmem:[%s1976_s4 + $0x20] sm:$0xff]  ;;  %v745_v44 = vld [vmem:[%s1976_s4 + $0x28] sm:$0xff]  ;;  %v746_v47 = vld [vmem:[%s1976_s4 + $0x30] sm:$0xff]  ;;  %p1342_p7 = scmp.lt.s32.totalorder %s1340_s15, %s1334_s26 }
  0x96   : > { %1117 = vmatpush1.bf16.msra.mxu0 %v1116_v14  ;;  %1087 = vmatprep.subr.bf16.mxu1 %v1086_v15  ;;  %v747_v48 = vld [vmem:[%s1976_s4 + $0x38] sm:$0xff]  ;;  %v748_v51 = vld [vmem:[%s1976_s4 + $0x40] sm:$0xff]  ;;  %v749_v52 = vld [vmem:[%s1976_s4 + $0x48] sm:$0xff]  ;;  %p1336_p9 = pnand %p1335_p5, %p1560_p10 }
  0x97   : > { %1119 = vmatprep.subr.bf16.mxu0 %v1118_v19  ;;  %773 = vperm.xlu1 %1245, %v743_v40   ;;  %v405_v49 = vld [vmem:[#allocation7 + $0x18] sm:$0xff]  ;;  %v406_v53 = vld [vmem:[#allocation7 + $0x20] sm:$0xff]  ;;  %v750_v55 = vld [vmem:[%s1976_s4 + $0x50] sm:$0xff]  ;;  %p1343_p4 = por %p1342_p7, %p1341_p2 }
  0x98   : > { %763 = vperm.xlu0 %1244, %v741_v39   ;;  %v389_v50 = vld [vmem:[%s1974_s2 + $0x18] sm:$0xff]  ;;  %v390_v54 = vld [vmem:[%s1974_s2 + $0x20] sm:$0xff]  ;;  %v407_v57 = vld [vmem:[#allocation7 + $0x28] sm:$0xff]  ;;  %p1337_p1 = pneg %p1336_p9 }
  0x99   : > { %1089 = vmatpush1.bf16.msra.mxu1 %v1088_v25  ;;  %v751_v56 = vld [vmem:[%s1976_s4 + $0x58] sm:$0xff]  ;;  %v391_v58 = vld [vmem:[%s1974_s2 + $0x28] sm:$0xff]  ;;  %v752_v59 = vld [vmem:[%s1976_s4 + $0x60] sm:$0xff] }
  0x9a   : > { %1121 = vmatpush1.bf16.msra.mxu0 %v1120_v26  ;;  %1091 = vmatprep.subr.bf16.mxu1 %v1090_v27  ;;  %v753_v60 = vld [vmem:[%s1976_s4 + $0x68] sm:$0xff]  ;;  %v408_v61 = vld [vmem:[#allocation7 + $0x30] sm:$0xff]  ;;  %v755_v1 = vld [vmem:[%s1976_s4 + $0x78] sm:$0xff]  ;;  %p1344_p8 = pnand %p1343_p4, %p1337_p1 }
  0x9b   : > { %1123 = vmatprep.subr.bf16.mxu0 %v1122_v30  ;;  %783 = vperm.xlu1 %1245, %v745_v44   ;;  %v392_v62 = vld [vmem:[%s1974_s2 + $0x30] sm:$0xff]  ;;  %v409_v2 = vld [vmem:[#allocation7 + $0x38] sm:$0xff]  ;;  %v410_v4 = vld [vmem:[#allocation7 + $0x40] sm:$0xff] }
  0x9c   : > { %778 = vperm.xlu0 %1244, %v744_v43   ;;  %v754_v63 = vld [vmem:[%s1976_s4 + $0x70] sm:$0xff]  ;;  %v393_v3 = vld [vmem:[%s1974_s2 + $0x38] sm:$0xff]  ;;  %v394_v5 = vld [vmem:[%s1974_s2 + $0x40] sm:$0xff] }
  0x9d   : > { %1093 = vmatpush1.bf16.msra.mxu1 %v1092_v33  ;;  %v411_v6 = vld [vmem:[#allocation7 + $0x48] sm:$0xff]  ;;  %v412_v8 = vld [vmem:[#allocation7 + $0x50] sm:$0xff]  ;;  %v413_v10 = vld [vmem:[#allocation7 + $0x58] sm:$0xff] }
  0x9e   : > { %1125 = vmatpush1.bf16.msra.mxu0 %v1124_v34  ;;  %v395_v7 = vld [vmem:[%s1974_s2 + $0x48] sm:$0xff]  ;;  %v396_v9 = vld [vmem:[%s1974_s2 + $0x50] sm:$0xff]  ;;  %v397_v11 = vld [vmem:[%s1974_s2 + $0x58] sm:$0xff] }
  0x9f   : > { %793 = vperm.xlu1 %1245, %v747_v48   ;;  %v414_v12 = vld [vmem:[#allocation7 + $0x60] sm:$0xff]  ;;  %v415_v14 = vld [vmem:[#allocation7 + $0x68] sm:$0xff]  ;;  %v416_v16 = vld [vmem:[#allocation7 + $0x70] sm:$0xff] }
  0xa0   : > { %483 = vmatmul.mubr.f32.vlgmr.msra.gmra.mrb[0].mxu1 %v402_v35  ;;  %788 = vperm.xlu0 %1244, %v746_v47   ;;  %v398_v13 = vld [vmem:[%s1974_s2 + $0x60] sm:$0xff]  ;;  %v399_v15 = vld [vmem:[%s1974_s2 + $0x68] sm:$0xff]  ;;  %v400_v17 = vld [vmem:[%s1974_s2 + $0x70] sm:$0xff] }
  0xa1   : > { %644 = vmatmul.mubr.f32.vlgmr.msra.gmra.mrb[0].mxu0 %v386_v38  ;;  %488 = vmatprep.mubr.f32.mxu1 %v1433_v0  ;;  %v417_v18 = vld [vmem:[#allocation7 + $0x78] sm:$0xff] }
  0xa2   : > { %649 = vmatprep.mubr.f32.mxu0 %v1433_v0  ;;  %v401_v19 = vld [vmem:[%s1974_s2 + $0x78] sm:$0xff] }
  0xa3   : > { %803 = vperm.xlu1 %1245, %v749_v52  }
  0xa4   : > { %489 = vmatmul.mubr.f32.gmra.mrb[2].mxu1 %v403_v41  ;;  %798 = vperm.xlu0 %1244, %v748_v51  }
  0xa5   : > { %650 = vmatmul.mubr.f32.gmra.mrb[2].mxu0 %v387_v42  ;;  %494 = vmatprep.mubr.f32.mxu1 %v1433_v0 }
  0xa6   : > { %655 = vmatprep.mubr.f32.mxu0 %v1433_v0 }
  0xa7   : > { %813 = vperm.xlu1 %1245, %v751_v56  }
  0xa8   : > { %495 = vmatmul.mubr.f32.gmra.mrb[4].mxu1 %v404_v45  ;;  %808 = vperm.xlu0 %1244, %v750_v55  }
  0xa9   : > { %656 = vmatmul.mubr.f32.gmra.mrb[4].mxu0 %v388_v46  ;;  %500 = vmatprep.mubr.f32.mxu1 %v1433_v0 }
  0xaa   : > { %661 = vmatprep.mubr.f32.mxu0 %v1433_v0 }
  0xab   : > { %823 = vperm.xlu1 %1245, %v753_v60  }
  0xac   : > { %501 = vmatmul.mubr.f32.gmra.mrb[6].mxu1 %v405_v49  ;;  %818 = vperm.xlu0 %1244, %v752_v59  }
  0xad   : > { %662 = vmatmul.mubr.f32.gmra.mrb[6].mxu0 %v389_v50  ;;  %506 = vmatprep.mubr.f32.mxu1 %v1433_v0 }
  0xae   : > { %667 = vmatprep.mubr.f32.mxu0 %v1433_v0 }
  0xaf   : > { %833 = vperm.xlu1 %1245, %v755_v1  }
  0xb0   : > { %507 = vmatmul.mubr.f32.gmra.mrb[8].mxu1 %v406_v53  ;;  %828 = vperm.xlu0 %1244, %v754_v63  }
  0xb1   : > { %668 = vmatmul.mubr.f32.gmra.mrb[8].mxu0 %v390_v54  ;;  %512 = vmatprep.mubr.f32.mxu1 %v1433_v0 }
  0xb2   : > { %673 = vmatprep.mubr.f32.mxu0 %v1433_v0 }
  0xb4   : > { %513 = vmatmul.mubr.f32.gmra.mrb[10].mxu1 %v407_v57 }
  0xb5   : > { %674 = vmatmul.mubr.f32.gmra.mrb[10].mxu0 %v391_v58  ;;  %518 = vmatprep.mubr.f32.mxu1 %v1433_v0 }
  0xb6   : > { %679 = vmatprep.mubr.f32.mxu0 %v1433_v0 }
  0xb8   : > { %519 = vmatmul.mubr.f32.gmra.mrb[12].mxu1 %v408_v61 }
  0xb9   : > { %680 = vmatmul.mubr.f32.gmra.mrb[12].mxu0 %v392_v62  ;;  %524 = vmatprep.mubr.f32.mxu1 %v1433_v0 }
  0xba   : > { %685 = vmatprep.mubr.f32.mxu0 %v1433_v0 }
  0xbc   : > { %525 = vmatmul.mubr.f32.gmra.mrb[14].mxu1 %v409_v2 }
  0xbd   : > { %686 = vmatmul.mubr.f32.gmra.mrb[14].mxu0 %v393_v3  ;;  %530 = vmatprep.mubr.f32.mxu1 %v1433_v0 }
  0xbe   : > { %691 = vmatprep.mubr.f32.mxu0 %v1433_v0 }
  0xc0   : > { %531 = vmatmul.mubr.f32.gmra.mrb[16].mxu1 %v410_v4 }
  0xc1   : > { %692 = vmatmul.mubr.f32.gmra.mrb[16].mxu0 %v394_v5  ;;  %536 = vmatprep.mubr.f32.mxu1 %v1433_v0 }
  0xc2   : > { %697 = vmatprep.mubr.f32.mxu0 %v1433_v0 }
  0xc4   : > { %537 = vmatmul.mubr.f32.gmra.mrb[18].mxu1 %v411_v6 }
  0xc5   : > { %698 = vmatmul.mubr.f32.gmra.mrb[18].mxu0 %v395_v7  ;;  %542 = vmatprep.mubr.f32.mxu1 %v1433_v0 }
  0xc6   : > { %703 = vmatprep.mubr.f32.mxu0 %v1433_v0 }
  0xc8   : > { %543 = vmatmul.mubr.f32.gmra.mrb[20].mxu1 %v412_v8 }
  0xc9   : > { %704 = vmatmul.mubr.f32.gmra.mrb[20].mxu0 %v396_v9  ;;  %548 = vmatprep.mubr.f32.mxu1 %v1433_v0 }
  0xca   : > { %709 = vmatprep.mubr.f32.mxu0 %v1433_v0 }
  0xcc   : > { %549 = vmatmul.mubr.f32.gmra.mrb[22].mxu1 %v413_v10 }
  0xcd   : > { %710 = vmatmul.mubr.f32.gmra.mrb[22].mxu0 %v397_v11  ;;  %554 = vmatprep.mubr.f32.mxu1 %v1433_v0 }
  0xce   : > { %715 = vmatprep.mubr.f32.mxu0 %v1433_v0 }
  0xd0   : > { %555 = vmatmul.mubr.f32.gmra.mrb[24].mxu1 %v414_v12 }
  0xd1   : > { %716 = vmatmul.mubr.f32.gmra.mrb[24].mxu0 %v398_v13  ;;  %560 = vmatprep.mubr.f32.mxu1 %v1433_v0 }
  0xd2   : > { %721 = vmatprep.mubr.f32.mxu0 %v1433_v0 }
  0xd4   : > { %561 = vmatmul.mubr.f32.gmra.mrb[26].mxu1 %v415_v14 }
  0xd5   : > { %722 = vmatmul.mubr.f32.gmra.mrb[26].mxu0 %v399_v15  ;;  %566 = vmatprep.mubr.f32.mxu1 %v1433_v0 }
  0xd6   : > { %727 = vmatprep.mubr.f32.mxu0 %v1433_v0 }
  0xd8   : > { %567 = vmatmul.mubr.f32.gmra.mrb[28].mxu1 %v416_v16 }
  0xd9   : > { %728 = vmatmul.mubr.f32.gmra.mrb[28].mxu0 %v400_v17  ;;  %572 = vmatprep.mubr.f32.mxu1 %v1433_v0 }
  0xda   : > { %733 = vmatprep.mubr.f32.mxu0 %v1433_v0 }
  0xdc   : > { %573 = vmatmul.mubr.f32.gmra.mrb[30].mxu1 %v417_v18 }
  0xdd   : > { %734 = vmatmul.mubr.f32.gmra.mrb[30].mxu0 %v401_v19 }
 0x112   : > { %v769_v36 = vpop.permute.xlu1 %768 }
 0x113   : > { %v759_v20 = vpop.permute.xlu0 %758 }
 0x116   : > { %v774_v51 = vpop.permute.xlu1 %773 }
 0x117   : > { %v764_v29 = vpop.permute.xlu0 %763 }
 0x11a   : > { %v784_v6 = vpop.permute.xlu1 %783 }
 0x11b   : > { %v779_v60 = vpop.permute.xlu0 %778 }
 0x11f   : > { %v789_v15 = vpop.permute.xlu0 %788 }
 0x173   : > { %v484_v21 = vpop.f32.mrb[0].mxu1 }
 0x174   : > { %v645_v22 = vpop.f32.mrb[0].mxu0  ;;  %v486_v23 = vpop.f32.mrb[1].mxu1 }
 0x175   : > { %v646_v24 = vadd.f32 %v645_v22, %v484_v21  ;;  %v647_v25 = vpop.f32.mrb[1].mxu0 }
 0x176   : > { %v648_v26 = vadd.f32 %v647_v25, %v486_v23 }
 0x177   : > { %v836_v27 = vadd.f32 %v759_v20, %v646_v24  ;;  %v490_v28 = vpop.f32.mrb[2].mxu1  ;;  %v794_v24 = vpop.permute.xlu1 %793 }
 0x178   : > { %v837_v30 = vadd.f32 %v759_v20, %v648_v26  ;;  %v651_v31 = vpop.f32.mrb[2].mxu0  ;;  %v492_v0 = vpop.f32.mrb[3].mxu1 }
 0x179   : > { %868 = vst [vmem:[%s1882_s25] sm:$0xff] %v836_v27  ;;  %v652_v32 = vadd.f32 %v651_v31, %v490_v28  ;;  %v653_v33 = vpop.f32.mrb[3].mxu0 }
 0x17a   : > { %869 = vst [vmem:[%s1882_s25 + $0x8] sm:$0xff] %v837_v30  ;;  %v654_v34 = vadd.f32 %v653_v33, %v492_v0 }
 0x17b   : > { %v838_v35 = vadd.f32 %v764_v29, %v652_v32  ;;  %v496_v37 = vpop.f32.mrb[4].mxu1  ;;  %v799_v32 = vpop.permute.xlu0 %798 }
 0x17c   : > { %v839_v38 = vadd.f32 %v764_v29, %v654_v34  ;;  %v657_v39 = vpop.f32.mrb[4].mxu0  ;;  %v498_v40 = vpop.f32.mrb[5].mxu1 }
 0x17d   : > { %870 = vst [vmem:[%s1882_s25 + $0x10] sm:$0xff] %v838_v35  ;;  %v658_v41 = vadd.f32 %v657_v39, %v496_v37  ;;  %v659_v42 = vpop.f32.mrb[5].mxu0 }
 0x17e   : > { %871 = vst [vmem:[%s1882_s25 + $0x18] sm:$0xff] %v839_v38  ;;  %v660_v43 = vadd.f32 %v659_v42, %v498_v40 }
 0x17f   : > { %v840_v44 = vadd.f32 %v769_v36, %v658_v41  ;;  %v502_v45 = vpop.f32.mrb[6].mxu1  ;;  %v804_v41 = vpop.permute.xlu1 %803 }
 0x180   : > { %v841_v46 = vadd.f32 %v769_v36, %v660_v43  ;;  %v663_v47 = vpop.f32.mrb[6].mxu0  ;;  %v504_v48 = vpop.f32.mrb[7].mxu1 }
 0x181   : > { %872 = vst [vmem:[%s1882_s25 + $0x20] sm:$0xff] %v840_v44  ;;  %v664_v49 = vadd.f32 %v663_v47, %v502_v45  ;;  %v665_v50 = vpop.f32.mrb[7].mxu0 }
 0x182   : > { %873 = vst [vmem:[%s1882_s25 + $0x28] sm:$0xff] %v841_v46  ;;  %v666_v52 = vadd.f32 %v665_v50, %v504_v48  ;;  %v809_v50 = vpop.permute.xlu0 %808 }
 0x183   : > { %v842_v53 = vadd.f32 %v774_v51, %v664_v49  ;;  %v508_v54 = vpop.f32.mrb[8].mxu1 }
 0x184   : > { %v843_v55 = vadd.f32 %v774_v51, %v666_v52  ;;  %v669_v56 = vpop.f32.mrb[8].mxu0  ;;  %v510_v57 = vpop.f32.mrb[9].mxu1 }
 0x185   : > { %874 = vst [vmem:[%s1882_s25 + $0x30] sm:$0xff] %v842_v53  ;;  %v670_v58 = vadd.f32 %v669_v56, %v508_v54  ;;  %v671_v59 = vpop.f32.mrb[9].mxu0 }
 0x186   : > { %875 = vst [vmem:[%s1882_s25 + $0x38] sm:$0xff] %v843_v55  ;;  %v672_v61 = vadd.f32 %v671_v59, %v510_v57  ;;  %v814_v59 = vpop.permute.xlu1 %813 }
 0x187   : > { %v844_v62 = vadd.f32 %v779_v60, %v670_v58  ;;  %v514_v63 = vpop.f32.mrb[10].mxu1 }
 0x188   : > { %v845_v1 = vadd.f32 %v779_v60, %v672_v61  ;;  %v675_v2 = vpop.f32.mrb[10].mxu0  ;;  %v516_v3 = vpop.f32.mrb[11].mxu1 }
 0x189   : > { %876 = vst [vmem:[%s1882_s25 + $0x40] sm:$0xff] %v844_v62  ;;  %v676_v4 = vadd.f32 %v675_v2, %v514_v63  ;;  %v677_v5 = vpop.f32.mrb[11].mxu0 }
 0x18a   : > { %877 = vst [vmem:[%s1882_s25 + $0x48] sm:$0xff] %v845_v1  ;;  %v678_v7 = vadd.f32 %v677_v5, %v516_v3  ;;  %v819_v5 = vpop.permute.xlu0 %818 }
 0x18b   : > { %v846_v8 = vadd.f32 %v784_v6, %v676_v4  ;;  %v520_v9 = vpop.f32.mrb[12].mxu1 }
 0x18c   : > { %v847_v10 = vadd.f32 %v784_v6, %v678_v7  ;;  %v681_v11 = vpop.f32.mrb[12].mxu0  ;;  %v522_v12 = vpop.f32.mrb[13].mxu1 }
 0x18d   : > { %878 = vst [vmem:[%s1882_s25 + $0x50] sm:$0xff] %v846_v8  ;;  %v682_v13 = vadd.f32 %v681_v11, %v520_v9  ;;  %v683_v14 = vpop.f32.mrb[13].mxu0 }
 0x18e   : > { %879 = vst [vmem:[%s1882_s25 + $0x58] sm:$0xff] %v847_v10  ;;  %v684_v16 = vadd.f32 %v683_v14, %v522_v12  ;;  %v824_v14 = vpop.permute.xlu1 %823 }
 0x18f   : > { %v848_v17 = vadd.f32 %v789_v15, %v682_v13  ;;  %v526_v18 = vpop.f32.mrb[14].mxu1 }
 0x190   : > { %v849_v19 = vadd.f32 %v789_v15, %v684_v16  ;;  %v687_v20 = vpop.f32.mrb[14].mxu0  ;;  %v528_v21 = vpop.f32.mrb[15].mxu1 }
 0x191   : > { %880 = vst [vmem:[%s1882_s25 + $0x60] sm:$0xff] %v848_v17  ;;  %v688_v22 = vadd.f32 %v687_v20, %v526_v18  ;;  %v689_v23 = vpop.f32.mrb[15].mxu0 }
 0x192   : > { %881 = vst [vmem:[%s1882_s25 + $0x68] sm:$0xff] %v849_v19  ;;  %v690_v25 = vadd.f32 %v689_v23, %v528_v21  ;;  %v829_v23 = vpop.permute.xlu0 %828 }
 0x193   : > { %v850_v26 = vadd.f32 %v794_v24, %v688_v22  ;;  %v532_v27 = vpop.f32.mrb[16].mxu1 }
 0x194   : > { %v851_v28 = vadd.f32 %v794_v24, %v690_v25  ;;  %v693_v29 = vpop.f32.mrb[16].mxu0  ;;  %v534_v30 = vpop.f32.mrb[17].mxu1 }
 0x195   : > { %882 = vst [vmem:[%s1882_s25 + $0x70] sm:$0xff] %v850_v26  ;;  %v694_v31 = vadd.f32 %v693_v29, %v532_v27  ;;  %v695_v0 = vpop.f32.mrb[17].mxu0 }
 0x196   : > { %883 = vst [vmem:[%s1882_s25 + $0x78] sm:$0xff] %v851_v28  ;;  %v696_v33 = vadd.f32 %v695_v0, %v534_v30  ;;  %v834_v0 = vpop.permute.xlu1 %833 }
 0x197   : > { %v852_v34 = vadd.f32 %v799_v32, %v694_v31  ;;  %v538_v35 = vpop.f32.mrb[18].mxu1 }
 0x198   : > { %v853_v36 = vadd.f32 %v799_v32, %v696_v33  ;;  %v699_v37 = vpop.f32.mrb[18].mxu0  ;;  %v540_v38 = vpop.f32.mrb[19].mxu1 }
 0x199   : > { %884 = vst [vmem:[%s1882_s25 + $0x80] sm:$0xff] %v852_v34  ;;  %v700_v39 = vadd.f32 %v699_v37, %v538_v35  ;;  %v701_v40 = vpop.f32.mrb[19].mxu0 }
 0x19a   : > { %885 = vst [vmem:[%s1882_s25 + $0x88] sm:$0xff] %v853_v36  ;;  %v702_v42 = vadd.f32 %v701_v40, %v540_v38 }
 0x19b   : > { %v854_v43 = vadd.f32 %v804_v41, %v700_v39  ;;  %v544_v44 = vpop.f32.mrb[20].mxu1 }
 0x19c   : > { %v855_v45 = vadd.f32 %v804_v41, %v702_v42  ;;  %v705_v46 = vpop.f32.mrb[20].mxu0  ;;  %v546_v47 = vpop.f32.mrb[21].mxu1 }
 0x19d   : > { %886 = vst [vmem:[%s1882_s25 + $0x90] sm:$0xff] %v854_v43  ;;  %v706_v48 = vadd.f32 %v705_v46, %v544_v44  ;;  %v707_v49 = vpop.f32.mrb[21].mxu0 }
 0x19e   : > { %887 = vst [vmem:[%s1882_s25 + $0x98] sm:$0xff] %v855_v45  ;;  %v708_v51 = vadd.f32 %v707_v49, %v546_v47 }
 0x19f   : > { %v856_v52 = vadd.f32 %v809_v50, %v706_v48  ;;  %v550_v53 = vpop.f32.mrb[22].mxu1 }
 0x1a0   : > { %v857_v54 = vadd.f32 %v809_v50, %v708_v51  ;;  %v711_v55 = vpop.f32.mrb[22].mxu0  ;;  %v552_v56 = vpop.f32.mrb[23].mxu1 }
 0x1a1   : > { %888 = vst [vmem:[%s1882_s25 + $0xa0] sm:$0xff] %v856_v52  ;;  %v712_v57 = vadd.f32 %v711_v55, %v550_v53  ;;  %v713_v58 = vpop.f32.mrb[23].mxu0 }
 0x1a2   : > { %889 = vst [vmem:[%s1882_s25 + $0xa8] sm:$0xff] %v857_v54  ;;  %v714_v60 = vadd.f32 %v713_v58, %v552_v56 }
 0x1a3   : > { %v858_v61 = vadd.f32 %v814_v59, %v712_v57  ;;  %v556_v62 = vpop.f32.mrb[24].mxu1 }
 0x1a4   : > { %v859_v63 = vadd.f32 %v814_v59, %v714_v60  ;;  %v717_v1 = vpop.f32.mrb[24].mxu0  ;;  %v558_v2 = vpop.f32.mrb[25].mxu1 }
 0x1a5   : > { %890 = vst [vmem:[%s1882_s25 + $0xb0] sm:$0xff] %v858_v61  ;;  %v718_v3 = vadd.f32 %v717_v1, %v556_v62  ;;  %v719_v4 = vpop.f32.mrb[25].mxu0 }
 0x1a6   : > { %891 = vst [vmem:[%s1882_s25 + $0xb8] sm:$0xff] %v859_v63  ;;  %v720_v6 = vadd.f32 %v719_v4, %v558_v2 }
 0x1a7   : > { %v860_v7 = vadd.f32 %v819_v5, %v718_v3  ;;  %v562_v8 = vpop.f32.mrb[26].mxu1 }
 0x1a8   : > { %v861_v9 = vadd.f32 %v819_v5, %v720_v6  ;;  %v723_v10 = vpop.f32.mrb[26].mxu0  ;;  %v564_v11 = vpop.f32.mrb[27].mxu1 }
 0x1a9   : > { %892 = vst [vmem:[%s1882_s25 + $0xc0] sm:$0xff] %v860_v7  ;;  %v724_v12 = vadd.f32 %v723_v10, %v562_v8  ;;  %v725_v13 = vpop.f32.mrb[27].mxu0 }
 0x1aa   : > { %893 = vst [vmem:[%s1882_s25 + $0xc8] sm:$0xff] %v861_v9  ;;  %v726_v15 = vadd.f32 %v725_v13, %v564_v11 }
 0x1ab   : > { %v862_v16 = vadd.f32 %v824_v14, %v724_v12  ;;  %v568_v17 = vpop.f32.mrb[28].mxu1 }
 0x1ac   : > { %v863_v18 = vadd.f32 %v824_v14, %v726_v15  ;;  %v729_v19 = vpop.f32.mrb[28].mxu0  ;;  %v570_v20 = vpop.f32.mrb[29].mxu1 }
 0x1ad   : > { %894 = vst [vmem:[%s1882_s25 + $0xd0] sm:$0xff] %v862_v16  ;;  %v730_v21 = vadd.f32 %v729_v19, %v568_v17  ;;  %v731_v22 = vpop.f32.mrb[29].mxu0 }
 0x1ae   : > { %895 = vst [vmem:[%s1882_s25 + $0xd8] sm:$0xff] %v863_v18  ;;  %v732_v24 = vadd.f32 %v731_v22, %v570_v20 }
 0x1af   : > { %v864_v25 = vadd.f32 %v829_v23, %v730_v21  ;;  %v574_v26 = vpop.f32.mrb[30].mxu1 }
 0x1b0   : > { %v865_v27 = vadd.f32 %v829_v23, %v732_v24  ;;  %v735_v28 = vpop.f32.mrb[30].mxu0  ;;  %v576_v29 = vpop.f32.mrb[31].mxu1 }
 0x1b1   : > { %896 = vst [vmem:[%s1882_s25 + $0xe0] sm:$0xff] %v864_v25  ;;  %v736_v30 = vadd.f32 %v735_v28, %v574_v26  ;;  %v737_v31 = vpop.f32.mrb[31].mxu0 }
 0x1b2   : > { %897 = vst [vmem:[%s1882_s25 + $0xe8] sm:$0xff] %v865_v27  ;;  %v738_v32 = vadd.f32 %v737_v31, %v576_v29 }
 0x1b3   : > { %v866_v33 = vadd.f32 %v834_v0, %v736_v30 }
 0x1b4   : > { %v867_v34 = vadd.f32 %v834_v0, %v738_v32 }
 0x1b5   : > { %898 = vst [vmem:[%s1882_s25 + $0xf0] sm:$0xff] %v866_v33 }
 0x1b6   : > { %899 = vst [vmem:[%s1882_s25 + $0xf8] sm:$0xff] %v867_v34 }
 0x1b7   : > { %1347 = shalt.err (!%p1344_p8)
}
 0x1b8   : > { %s1348_s8 = scalar_lea.hbm %s1919_s24, 4096  ;;  %s1352_s3 = scalar_lea.hbm %s1977_s5, 8192 }
 0x1b9   : > { %p1349_p12 = scmp.ne.s32.totalorder %s1919_s24, %s1348_s8  ;;  %p1353_p6 = scmp.lt.u32.totalorder %s1919_s24, %s1977_s5 }
 0x1ba   : > { %p1354_p13 = scmp.lt.u32.totalorder %s1352_s3, %s1348_s8  ;;  %p1356_p5 = scmp.lt.u32.totalorder %s1348_s8, %s1919_s24 }
 0x1bb   : > { %p1350_p11 = pnand %p1349_p12, %p1560_p10 }
 0x1bc   : > { %p1355_p0 = por %p1354_p13, %p1353_p6 }
 0x1bd   : > { %p1351_p3 = pneg %p1350_p11 }
 0x1be   : > { %p1357_p9 = por %p1356_p5, %p1355_p0 }
 0x1c0   : > { %p1358_p1 = pnand %p1357_p9, %p1351_p3 }
 0x1c2   : > { %1361 = shalt.err (!%p1358_p1)
}
 0x1c3   : > { %s1436_s13 = smov 256   ;;  %s1437_s29 = smov 16  }
 0x1c4   : > { %1166 = dma.vmem_to_hbm [thread:$0]  (%p1560_p10), %s1921_s0, 4096, %s1919_s24, %s901_s21, %s1436_s13, %s1436_s13, %s1437_s29  }
 0x1c5 PF: > { %s931_s25 = sand.u32 1, %s1404_s18   ;;  %p2002_p2 = scmp.ne.s32.totalorder %s1986_s27, 0 }
 0x1c6   : > { %p2003_p7 = scmp.ge.s32.totalorder %s1424_s23, 2  ;;  %s932_s16 = scalar_lea.sflag [#allocation4], %s931_s25 }
 0x1c8   : > { %p1180_p4 = pnand %p2003_p7, %p2002_p2 }
 0x1ca   : > { %1399 = dma.done.wait (!%p1180_p4), %s932_s16, 4096  }
 0x1cb   : > { %1401 = vsyncadd (!%p1180_p4), %s932_s16, 4294963200  ;;  %s24_s23 = sadd.s32 1, %s1424_s23   ;;  %s2004_s28 = sld [smem:[#allocation14_spill]] }
 0x1cc   : > { %p21_p8 = scmp.ge.s32.totalorder %s24_s23, 4   ;;  %s2005_s6 = sld [smem:[#allocation13_spill]] }
 0x1cd   : > { %s2006_s18 = smov %s1408_s19  ;;  %s2007_s19 = smov %s1412_s20 }
 0x1ce   : > { %s2009_s21 = smov %s1420_s22  ;;  %23 = sbr.rel (!%p21_p8) target bundleno = 11 (0xb), region = 102 }
 0x1d1   : > { %s2008_s20 = smov %s2004_s28 }
 0x1d2   : > { %s2010_s22 = smov %s2005_s6 }
 0x1d5   :  { %937 = vsyncpa [#allocation3], 1 }
 0x1d6   :  { %939 = vsyncpa [#allocation3 + $0x1], 1 }
 0x1d7   :  { %940 = vsyncpa [#allocation6], 1 }
 0x1d8   :  { %942 = vsyncpa [#allocation6 + $0x1], 1 }
 0x1d9   :  { %943 = vsyncpa [#allocation4], 1 }
 0x1da   :  { %945 = vsyncpa [#allocation4 + $0x1], 1 }

</bundles_post_ra>
